<compile_context>
chip_gen: v7x
topology: tpu7x:2x2x1
jax: 0.10.0
libtpu: 0.0.40
codegen_flags: <defaults>
</compile_context>

<pallas_src>
import functools

import jax
import jax.numpy as jnp
from jax.experimental import pallas as pl
from jax.experimental.pallas import tpu as pltpu


def _round_up(x, m):
    return (x + m - 1) // m * m


def _default_vmem_limit():
    """Generation-aware VMEM cap: 75% of physical per-core VMEM."""
    try:
        cap = int(pltpu.get_tpu_info().vmem_capacity_bytes)
    except Exception:
        cap = 64 * 1024 * 1024          # conservative fallback (v7x per-core)
    return max(32 * 1024 * 1024, (cap * 3) // 4)


_VMEM_LIMIT = _default_vmem_limit()
_TILE_R_MAX = 2048                       # head row-tile (feedback: 2048-4096)
_CONV_IN_BLOCK_BUDGET = 8 * 1024 * 1024  # per-block input budget for the conv


# ----------------------------------------------------------------------------
# Kernels
# ----------------------------------------------------------------------------
def _conv1x1_small_k_kernel(x_ref, w_ref, b_ref, o_ref):
    """1x1 conv with tiny contraction dim: VPU broadcast-MAC (skips the MXU)."""
    x = x_ref[0]                       # (Cin, T)    f32
    w = w_ref[...]                     # (Cout, Cin) f32
    cout, cin = w.shape
    t = x.shape[-1]
    acc = jnp.zeros((cout, t), jnp.float32)
    for c in range(cin):               # static, tiny (Cin <= 8)
        acc = acc + w[:, c:c + 1] * x[c:c + 1, :]
    o_ref[0] = acc + b_ref[...]


def _conv1x1_mxu_kernel(x_ref, w_ref, b_ref, o_ref):
    """1x1 conv as (Cout,Cin)@(Cin,T) on the MXU.

    Input arrives f32 (no wrapper cast pass); cast to bf16 on the VPU here,
    f32 accumulation on the MXU.
    """
    x = x_ref[0].astype(jnp.bfloat16)
    o_ref[0] = (
        jnp.dot(w_ref[...], x, preferred_element_type=jnp.float32)
        + b_ref[...]
    )


def _head_kernel(h_ref,
                 wc_ref, bc_ref,       # class-embed Linear (cols [0:Ncls])
                 w1_ref, b1_ref,       # bbox MLP layer 1
                 w2_ref, b2_ref,       # bbox MLP layer 2
                 w3_ref, b3_ref,       # bbox MLP layer 3 (cols [Ncls:Ncls+4])
                 out_ref,              # (TILE_R, W_OUT) packed logits+boxes
                 *, ncls):
    h = h_ref[0]                                             # (TILE_R, H) bf16
    # classification logits; weight columns >= ncls are zero so the box lanes
    # of this term are exactly 0.
    logits = jnp.dot(h, wc_ref[0], preferred_element_type=jnp.float32) + bc_ref[0]
    # bbox MLP: Linear+ReLU, Linear+ReLU, Linear, sigmoid (f32 epilogue,
    # intermediates re-cast to bf16 for the next MXU pass)
    x = jnp.dot(h, w1_ref[0], preferred_element_type=jnp.float32) + b1_ref[0]
    x = jnp.maximum(x, 0.0).astype(jnp.bfloat16)
    x = jnp.dot(x, w2_ref[0], preferred_element_type=jnp.float32) + b2_ref[0]
    x = jnp.maximum(x, 0.0).astype(jnp.bfloat16)
    # final weight is column-shifted so the 4 box outputs land in lanes
    # [ncls : ncls+4] of the shared slab.
    x = jnp.dot(x, w3_ref[0], preferred_element_type=jnp.float32) + b3_ref[0]
    boxes = jax.nn.sigmoid(x)
    lane = jax.lax.broadcasted_iota(jnp.int32, boxes.shape, 1)
    box_mask = (lane >= ncls) & (lane < ncls + 4)
    out_ref[0] = logits + jnp.where(box_mask, boxes, 0.0)


# ----------------------------------------------------------------------------
# Wrappers
# ----------------------------------------------------------------------------
@jax.jit
def input_proj(src_nchw, w, b):
    """1x1 Conv2d as a gridded Pallas matmul.

    src: [B, Cin, H, W], w: [Cout, Cin], b: [Cout]  ->  [B, Cout, H, W]
    Channels stay first; the spatial axis is the lane axis and is tiled over
    the grid (partial last tile masked — no wrapper pad/slice passes).
    """
    B, Cin, H, W = src_nchw.shape
    Cout = w.shape[0]
    HW = H * W

    # Spatial tile: as large as possible (amortize step overhead) while the
    # f32 input block stays within an 8 MiB budget (x2 for double-buffering).
    max_tile = _CONV_IN_BLOCK_BUDGET // max(1, Cin * 4)
    max_tile = max(256, (max_tile // 128) * 128)
    TILE_HW = min(2048, max_tile, _round_up(HW, 128))

    x = src_nchw.reshape(B, Cin, HW)          # f32, no pad, no cast

    small_k = Cin <= 8
    if small_k:
        kernel = _conv1x1_small_k_kernel
        w_in = w.astype(jnp.float32)
    else:
        kernel = _conv1x1_mxu_kernel
        w_in = w.astype(jnp.bfloat16)          # tiny; in-kernel cast for x
    b2d = b.reshape(Cout, 1).astype(jnp.float32)

    cost = pl.CostEstimate(
        flops=2 * B * HW * Cin * Cout,
        transcendentals=0,
        bytes_accessed=(B * Cin * HW * 4 + Cout * Cin * w_in.dtype.itemsize
                        + Cout * 4 + B * Cout * HW * 4),
    )

    out = pl.pallas_call(
        kernel,
        out_shape=jax.ShapeDtypeStruct((B, Cout, HW), jnp.float32),
        grid=(B, pl.cdiv(HW, TILE_HW)),
        in_specs=[
            pl.BlockSpec((1, Cin, TILE_HW), lambda bi, si: (bi, 0, si)),
            pl.BlockSpec((Cout, Cin), lambda bi, si: (0, 0)),   # resident
            pl.BlockSpec((Cout, 1), lambda bi, si: (0, 0)),     # resident
        ],
        out_specs=pl.BlockSpec((1, Cout, TILE_HW), lambda bi, si: (bi, 0, si)),
        compiler_params=pltpu.CompilerParams(
            dimension_semantics=("parallel", "parallel"),
            vmem_limit_bytes=_VMEM_LIMIT),
        cost_estimate=cost,
    )(x, w_in, b2d)

    # TODO(synk): emit bf16 here instead of f32 if the downstream (external)
    # transformer consumes bf16 — halves the conv's HBM writeback.
    return out.reshape(B, Cout, H, W)


@jax.jit
def mot_prediction_heads(hs, puppet_hs, head_params, puppet_head_params):
    """Fused main + puppet prediction heads.

    hs / puppet_hs: [L, B, Q, H].
    Returns ((logits, boxes), (puppet_logits, puppet_boxes)) with
    logits [L,B,Q,Ncls] and boxes [L,B,Q,4] (sigmoid applied).
    """
    L, B, Q, H = hs.shape
    Ncls = head_params["wc"].shape[1]
    W_OUT = _round_up(Ncls + 4, 128)    # shared lane-dense logits+boxes slab
    rows = L * B * Q
    TILE_R = min(_TILE_R_MAX, _round_up(rows, 16))
    n_row_tiles = pl.cdiv(rows, TILE_R)

    def flat(h):
        return h.reshape(rows, H).astype(jnp.bfloat16)

    h_all = jnp.stack([flat(hs), flat(puppet_hs)], axis=0)      # (2, rows, H)

    def pack(p):
        # class weight/bias occupy lanes [0:Ncls]; zeros elsewhere.
        wc = jnp.pad(p["wc"].astype(jnp.bfloat16), ((0, 0), (0, W_OUT - Ncls)))
        bc = jnp.pad(p["bc"].reshape(1, Ncls).astype(jnp.float32),
                     ((0, 0), (0, W_OUT - Ncls)))
        # final bbox weight/bias shifted to lanes [Ncls:Ncls+4]; zeros elsewhere.
        w3 = jnp.pad(p["w3"].astype(jnp.bfloat16),
                     ((0, 0), (Ncls, W_OUT - Ncls - 4)))
        b3 = jnp.pad(p["b3"].reshape(1, 4).astype(jnp.float32),
                     ((0, 0), (Ncls, W_OUT - Ncls - 4)))
        return (wc, bc,
                p["w1"].astype(jnp.bfloat16),
                p["b1"].reshape(1, H).astype(jnp.float32),
                p["w2"].astype(jnp.bfloat16),
                p["b2"].reshape(1, H).astype(jnp.float32),
                w3, b3)

    packed = [jnp.stack(pair, axis=0)
              for pair in zip(pack(head_params), pack(puppet_head_params))]
    wc_a, bc_a, w1_a, b1_a, w2_a, b2_a, w3_a, b3_a = packed

    def row_map(g, i):
        return (g, i, 0)

    def res_map(g, i):
        return (g, 0, 0)

    weight_bytes = sum(int(a.size) * a.dtype.itemsize for a in packed)
    cost = pl.CostEstimate(
        flops=2 * 2 * rows * H * (W_OUT + H + H + W_OUT),
        transcendentals=2 * rows * W_OUT,
        bytes_accessed=(int(h_all.size) * 2 + weight_bytes
                        + 2 * rows * W_OUT * 4),
    )

    out_slab = pl.pallas_call(
        functools.partial(_head_kernel, ncls=Ncls),
        out_shape=jax.ShapeDtypeStruct((2, rows, W_OUT), jnp.float32),
        grid=(2, n_row_tiles),
        in_specs=[
            pl.BlockSpec((1, TILE_R, H), row_map),
            pl.BlockSpec((1, H, W_OUT), res_map),    # weights resident per head
            pl.BlockSpec((1, 1, W_OUT), res_map),
            pl.BlockSpec((1, H, H), res_map),
            pl.BlockSpec((1, 1, H), res_map),
            pl.BlockSpec((1, H, H), res_map),
            pl.BlockSpec((1, 1, H), res_map),
            pl.BlockSpec((1, H, W_OUT), res_map),
            pl.BlockSpec((1, 1, W_OUT), res_map),
        ],
        out_specs=pl.BlockSpec((1, TILE_R, W_OUT), row_map),
        compiler_params=pltpu.CompilerParams(
            # leading head axis "parallel" -> sharded across the 2 TCs on v7x
            dimension_semantics=("parallel", "parallel"),
            vmem_limit_bytes=_VMEM_LIMIT),
        cost_estimate=cost,
    )(h_all, wc_a, bc_a, w1_a, b1_a, w2_a, b2_a, w3_a, b3_a)

    logits = out_slab[:, :, :Ncls].reshape(2, L, B, Q, Ncls)
    boxes = out_slab[:, :, Ncls:Ncls + 4].reshape(2, L, B, Q, 4)
    return (logits[0], boxes[0]), (logits[1], boxes[1])


# ----------------------------------------------------------------------------
# Parameter construction + pure-JAX references
# ----------------------------------------------------------------------------
def make_head_params(key, hidden_dim, num_classes):
    ks = jax.random.split(key, 8)
    s = 0.1
    return {
        "wc": s * jax.random.normal(ks[0], (hidden_dim, num_classes), jnp.float32),
        "bc": s * jax.random.normal(ks[1], (num_classes,), jnp.float32),
        "w1": s * jax.random.normal(ks[2], (hidden_dim, hidden_dim), jnp.float32),
        "b1": s * jax.random.normal(ks[3], (hidden_dim,), jnp.float32),
        "w2": s * jax.random.normal(ks[4], (hidden_dim, hidden_dim), jnp.float32),
        "b2": s * jax.random.normal(ks[5], (hidden_dim,), jnp.float32),
        "w3": s * jax.random.normal(ks[6], (hidden_dim, 4), jnp.float32),
        "b3": s * jax.random.normal(ks[7], (4,), jnp.float32),
    }


def ref_input_proj(src, w, b):
    """Pure-JAX reference mirroring the kernel's numeric path per Cin regime."""
    Cin = src.shape[1]
    if Cin <= 8:
        out = jnp.einsum("bchw,dc->bdhw", src, w,
                         precision=jax.lax.Precision.HIGHEST)
    else:
        out = jnp.einsum("bchw,dc->bdhw",
                         src.astype(jnp.bfloat16), w.astype(jnp.bfloat16),
                         preferred_element_type=jnp.float32)
    return out + b[None, :, None, None]


def ref_head(hs, p):
    """Pure-JAX reference mirroring the kernel's bf16-in / f32-accum matmuls."""
    L, B, Q, H = hs.shape
    Ncls = p["wc"].shape[1]
    h = hs.reshape(-1, H).astype(jnp.bfloat16)

    def mm(a, w):
        return jnp.dot(a, w.astype(jnp.bfloat16),
                       preferred_element_type=jnp.float32)

    logits = mm(h, p["wc"]) + p["bc"]
    x = jax.nn.relu(mm(h, p["w1"]) + p["b1"]).astype(jnp.bfloat16)
    x = jax.nn.relu(mm(x, p["w2"]) + p["b2"]).astype(jnp.bfloat16)
    x = mm(x, p["w3"]) + p["b3"]
    return (logits.reshape(L, B, Q, Ncls),
            jax.nn.sigmoid(x).reshape(L, B, Q, 4))


if __name__ == "__main__":
    key = jax.random.PRNGKey(0)

    # Small, MOT_Transformer-consistent shapes
    B = 2                  # batch (after samples.extend(next_samples))
    backbone_channels = 4  # backbone.num_channels
    Hs, Ws = 16, 16        # spatial size of last backbone feature map
    hidden_dim = 32        # transformer.d_model
    num_queries = 8
    num_obj_classes = 5    # num_classes['obj_labels']
    L = 2                  # decoder layers (hs leading dim)

    (k_src, k_hs, k_phs, k_proj_w, k_proj_b,
     k_head, k_phead, k_qemb, k_pqemb) = jax.random.split(key, 9)

    # --- inputs produced by external submodules (not translated) ---
    src = jax.random.normal(k_src, (B, backbone_channels, Hs, Ws), jnp.float32)
    hs = jax.random.normal(k_hs, (L, B, num_queries, hidden_dim), jnp.float32)
    puppet_hs = jax.random.normal(k_phs, (L, B, num_queries, hidden_dim), jnp.float32)

    # --- MOT_Transformer's own parameters ---
    proj_w = 0.1 * jax.random.normal(k_proj_w, (hidden_dim, backbone_channels), jnp.float32)
    proj_b = 0.1 * jax.random.normal(k_proj_b, (hidden_dim,), jnp.float32)
    head_params = make_head_params(k_head, hidden_dim, num_obj_classes)
    puppet_head_params = make_head_params(k_phead, hidden_dim, num_obj_classes)
    # query-embedding parameters (consumed by the external transformer)
    mot_query_embed = jax.random.normal(k_qemb, (num_queries, hidden_dim), jnp.float32)
    puppet_mot_query_embed = jax.random.normal(k_pqemb, (num_queries, hidden_dim), jnp.float32)

    # --- forward ---
    projected = input_proj(src, proj_w, proj_b)                    # [B, hidden, H, W]
    (outputs_class, outputs_coord), (p_outputs_class, p_outputs_coord) = (
        mot_prediction_heads(hs, puppet_hs, head_params, puppet_head_params))

    out = {
        "pred_logits": outputs_class[-1],
        "pred_boxes": outputs_coord[-1],
        "puppet_pred_logits": p_outputs_class[-1],
        "puppet_pred_boxes": p_outputs_coord[-1],
    }
    jax.block_until_ready(out)
    jax.block_until_ready(projected)

    # --- correctness checks vs pure-JAX references ---
    ref_proj = ref_input_proj(src, proj_w, proj_b)
    proj_tol = 1e-4 if backbone_channels <= 8 else 2e-2
    assert jnp.allclose(projected, ref_proj, atol=proj_tol), "input_proj mismatch"

    r_logits, r_boxes = ref_head(hs, head_params)
    assert jnp.allclose(outputs_class, r_logits, atol=1e-3), "class head mismatch"
    assert jnp.allclose(outputs_coord, r_boxes, atol=1e-3), "bbox head mismatch"

    pr_logits, pr_boxes = ref_head(puppet_hs, puppet_head_params)
    assert jnp.allclose(p_outputs_class, pr_logits, atol=1e-3), "puppet class head mismatch"
    assert jnp.allclose(p_outputs_coord, pr_boxes, atol=1e-3), "puppet bbox head mismatch"

    print("KERNEL_OK")
</pallas_src>

<mosaic_0001>
module attributes {stable_mosaic.version = 11 : i64} {
  func.func @_conv1x1_small_k_kernel(%arg0: i32, %arg1: i32, %arg2: memref<1x4x256xf32, #tpu.memory_space<vmem>>, %arg3: memref<32x4xf32, #tpu.memory_space<vmem>>, %arg4: memref<32x1xf32, #tpu.memory_space<vmem>>, %arg5: memref<1x32x256xf32, #tpu.memory_space<vmem>>) attributes {dimension_semantics = [#tpu.dimension_semantics<parallel>, #tpu.dimension_semantics<parallel>], iteration_bounds = array<i64: 2, 1>, scalar_prefetch = 0 : i64, scratch_operands = 0 : i64, tpu.core_type = #tpu.core_type<tc>, window_params = [{transform_indices = @transform_0, window_bounds = array<i64: 1, 4, 256>}, {pipeline_mode = #tpu.pipeline_mode<synchronous>, transform_indices = @transform_1, window_bounds = array<i64: 32, 4>}, {pipeline_mode = #tpu.pipeline_mode<synchronous>, transform_indices = @transform_2, window_bounds = array<i64: 32, 1>}, {transform_indices = @transform_3, window_bounds = array<i64: 1, 32, 256>}]} {
    %c0 = arith.constant 0 : index
    %c0_0 = arith.constant 0 : index
    %c0_1 = arith.constant 0 : index
    %0 = vector.load %arg2[%c0, %c0_0, %c0_1] : memref<1x4x256xf32, #tpu.memory_space<vmem>>, vector<1x4x256xf32>
    %1 = vector.shape_cast %0 : vector<1x4x256xf32> to vector<4x256xf32>
    %c0_2 = arith.constant 0 : index
    %c0_3 = arith.constant 0 : index
    %2 = vector.load %arg3[%c0_2, %c0_3] : memref<32x4xf32, #tpu.memory_space<vmem>>, vector<32x4xf32>
    %cst = arith.constant 0.000000e+00 : f32
    %3 = vector.broadcast %cst : f32 to vector<32x256xf32>
    %4 = vector.extract_strided_slice %2 {offsets = [0, 0], sizes = [32, 1], strides = [1, 1]} : vector<32x4xf32> to vector<32x1xf32>
    %5 = vector.extract_strided_slice %1 {offsets = [0, 0], sizes = [1, 256], strides = [1, 1]} : vector<4x256xf32> to vector<1x256xf32>
    %6 = vector.broadcast %4 : vector<32x1xf32> to vector<32x256xf32>
    %7 = vector.broadcast %5 : vector<1x256xf32> to vector<32x256xf32>
    %8 = arith.mulf %6, %7 : vector<32x256xf32>
    %9 = arith.addf %3, %8 : vector<32x256xf32>
    %10 = vector.extract_strided_slice %2 {offsets = [0, 1], sizes = [32, 1], strides = [1, 1]} : vector<32x4xf32> to vector<32x1xf32>
    %11 = vector.extract_strided_slice %1 {offsets = [1, 0], sizes = [1, 256], strides = [1, 1]} : vector<4x256xf32> to vector<1x256xf32>
    %12 = vector.broadcast %10 : vector<32x1xf32> to vector<32x256xf32>
    %13 = vector.broadcast %11 : vector<1x256xf32> to vector<32x256xf32>
    %14 = arith.mulf %12, %13 : vector<32x256xf32>
    %15 = arith.addf %9, %14 : vector<32x256xf32>
    %16 = vector.extract_strided_slice %2 {offsets = [0, 2], sizes = [32, 1], strides = [1, 1]} : vector<32x4xf32> to vector<32x1xf32>
    %17 = vector.extract_strided_slice %1 {offsets = [2, 0], sizes = [1, 256], strides = [1, 1]} : vector<4x256xf32> to vector<1x256xf32>
    %18 = vector.broadcast %16 : vector<32x1xf32> to vector<32x256xf32>
    %19 = vector.broadcast %17 : vector<1x256xf32> to vector<32x256xf32>
    %20 = arith.mulf %18, %19 : vector<32x256xf32>
    %21 = arith.addf %15, %20 : vector<32x256xf32>
    %22 = vector.extract_strided_slice %2 {offsets = [0, 3], sizes = [32, 1], strides = [1, 1]} : vector<32x4xf32> to vector<32x1xf32>
    %23 = vector.extract_strided_slice %1 {offsets = [3, 0], sizes = [1, 256], strides = [1, 1]} : vector<4x256xf32> to vector<1x256xf32>
    %24 = vector.broadcast %22 : vector<32x1xf32> to vector<32x256xf32>
    %25 = vector.broadcast %23 : vector<1x256xf32> to vector<32x256xf32>
    %26 = arith.mulf %24, %25 : vector<32x256xf32>
    %27 = arith.addf %21, %26 : vector<32x256xf32>
    %c0_4 = arith.constant 0 : index
    %c0_5 = arith.constant 0 : index
    %28 = vector.load %arg4[%c0_4, %c0_5] : memref<32x1xf32, #tpu.memory_space<vmem>>, vector<32x1xf32>
    %29 = vector.broadcast %28 : vector<32x1xf32> to vector<32x256xf32>
    %30 = arith.addf %27, %29 : vector<32x256xf32>
    %c0_6 = arith.constant 0 : index
    %c0_7 = arith.constant 0 : index
    %c0_8 = arith.constant 0 : index
    %31 = vector.load %arg5[%c0_6, %c0_7, %c0_8] : memref<1x32x256xf32, #tpu.memory_space<vmem>>, vector<1x32x256xf32>
    %32 = vector.shape_cast %31 : vector<1x32x256xf32> to vector<32x256xf32>
    %33 = vector.shape_cast %30 : vector<32x256xf32> to vector<1x32x256xf32>
    tpu.vector_store %arg5[%c0_6, %c0_7, %c0_8], %33 {strides = array<i32>} : memref<1x32x256xf32, #tpu.memory_space<vmem>>, vector<1x32x256xf32>,
    return
  }
  func.func @transform_0(%arg0: i32, %arg1: i32) -> (i32, i32, i32) {
    %c0_i32 = arith.constant 0 : i32
    %c0_i32_0 = arith.constant 0 : i32
    return %arg0, %c0_i32, %arg1 : i32, i32, i32
  }
  func.func @transform_1(%arg0: i32, %arg1: i32) -> (i32, i32) {
    %c0_i32 = arith.constant 0 : i32
    %c0_i32_0 = arith.constant 0 : i32
    %c0_i32_1 = arith.constant 0 : i32
    return %c0_i32, %c0_i32_0 : i32, i32
  }
  func.func @transform_2(%arg0: i32, %arg1: i32) -> (i32, i32) {
    %c0_i32 = arith.constant 0 : i32
    %c0_i32_0 = arith.constant 0 : i32
    %c0_i32_1 = arith.constant 0 : i32
    return %c0_i32, %c0_i32_0 : i32, i32
  }
  func.func @transform_3(%arg0: i32, %arg1: i32) -> (i32, i32, i32) {
    %c0_i32 = arith.constant 0 : i32
    %c0_i32_0 = arith.constant 0 : i32
    return %arg0, %c0_i32, %arg1 : i32, i32, i32
  }
}

</mosaic_0001>

<bundles_post_ra>
// kernel: input_proj.1
= control target key start
LH: loop header
LB: loop body
LE: loop exit
PB: predicated region body
PF: predicated region fallthrough
CT: control target
= control target key end

     0   :  { %s646_s12 = smov 0   ;;  %s648_s13 = smov 0   ;;  %s733_s0 = inlined_call_operand.vmem [shape: f32[2,4,256], index: 0, kind: input, shape index: {}]   ;;  %s734_s1 = inlined_call_operand.vmem [shape: f32[32,4], index: 1, kind: input, shape index: {}]   ;;  %s735_s2 = inlined_call_operand.vmem [shape: f32[32,1], index: 2, kind: input, shape index: {}]   ;;  %s736_s3 = inlined_call_operand.vmem [shape: f32[2,32,256], index: 3, kind: output, shape index: {}]  }
   0x1   :  { %s650_s14 = smov 0  }
   0x2 LB: > { %s25_s15 = sadd.s32 1, %s616_s13  ;;  %p551_p0 = scmp.ge.s32.totalorder %s620_s14, 1  ;;  %s620_s14 = sphi %s650_s14, %s13_s14   ;;  %s616_s13 = sphi %s648_s13, %s738_s13   ;;  %s612_s12 = sphi %s646_s12, %s737_s12  }
   0x3   : > { %p27_p1 = scmp.ge.s32.totalorder %s25_s15, 2  ;;  %p158_p2 = scmp.lt.s32.totalorder %s620_s14, 3 }
   0x5   : > { %s740_s15 = smov (%p27_p1, %s25_s15), 0  ;;  %p159_p3 = pnand %p551_p0, %p158_p2 }
   0x6   : > { %v213_v0 = vld [vmem:[%s734_s1 + $0x10] sm:$0xff] (!%p159_p3)  ;;  %v211_v1 = vld [vmem:[%s734_s1] sm:$0xff] (!%p159_p3)  ;;  %v622_v2 = vmov (!%p159_p3), 0   ;;  %v214_v3 = vld [vmem:[%s734_s1 + $0x18] sm:$0xff] (!%p159_p3)  ;;  %v623_v5 = vmov (!%p159_p3), 1   ;;  %v624_v6 = vmov (!%p159_p3), 2   ;;  %v236_v16 = vlaneseq (!%p159_p3) }
   0x7   : > { %162 = sbr.rel (%p159_p3) target bundleno = 187 (0xbb), region = 32  ;;  %589 = vset.pattern.permute.xlu1 (!%p159_p3), %v622_v2  ;;  %588 = vset.pattern.permute.xlu0 (!%p159_p3), %v622_v2  ;;  %v212_v4 = vld [vmem:[%s734_s1 + $0x8] sm:$0xff] (!%p159_p3)  ;;  %v625_v7 = vmov (!%p159_p3), 3   ;;  %v420_v9 = vld [vmem:[%s735_s2] sm:$0xff] (!%p159_p3)  ;;  %v422_v10 = vld [vmem:[%s735_s2 + $0x10] sm:$0xff] (!%p159_p3)  ;;  %p191_p4 = scmp.lt.s32.totalorder (!%p159_p3), %s612_s12, 1 }
   0x8   : > { %227 = vperm.xlu1 (!%p159_p3), %589, %v213_v0   ;;  %217 = vperm.xlu0 (!%p159_p3), %588, %v211_v1   ;;  %v421_v8 = vld [vmem:[%s735_s2 + $0x8] sm:$0xff] (!%p159_p3)  ;;  %v423_v11 = vld [vmem:[%s735_s2 + $0x18] sm:$0xff] (!%p159_p3)  ;;  %v237_v19 = vshrl.u32 (!%p159_p3), %v236_v16, 7 }
   0xa   : > { %v288_v22 = vsub.s32 (!%p159_p3), 1, %v237_v19  ;;  %v292_v23 = vsub.s32 (!%p159_p3), 5, %v237_v19  ;;  %v238_v24 = vsub.s32 (!%p159_p3), 0, %v237_v19  ;;  %v242_v25 = vsub.s32 (!%p159_p3), 4, %v237_v19 }
   0xb   : > { %v338_v26 = vsub.s32 (!%p159_p3), 2, %v237_v19  ;;  %v342_v27 = vsub.s32 (!%p159_p3), 6, %v237_v19  ;;  %v388_v37 = vsub.s32 (!%p159_p3), 3, %v237_v19  ;;  %v392_v38 = vsub.s32 (!%p159_p3), 7, %v237_v19 }
   0xc   : > { %232 = vperm.xlu1 (!%p159_p3), %589, %v214_v3   ;;  %222 = vperm.xlu0 (!%p159_p3), %588, %v212_v4  }
   0xe   : > { %s742_s12 = smov (!%p191_p4, %s612_s12), 1 }
   0xf   : > { %s558_s5 = sshll.u32 %s742_s12, 3  ;;  %s559_s9 = sshll.u32 %s742_s12, 6 }
  0x10   : > { %591 = vset.pattern.permute.xlu1 %v623_v5  ;;  %590 = vset.pattern.permute.xlu0 %v623_v5  ;;  %s198_s8 = scalar_lea.vmem %s733_s0, %s558_s5  ;;  %s712_s12 = scalar_lea.vmem %s736_s3, %s559_s9 }
  0x11   : > { %275 = vperm.xlu1 %591, %v212_v4   ;;  %271 = vperm.xlu0 %590, %v211_v1   ;;  %v210_v28 = vld [vmem:[%s198_s8] sm:$0xff] }
  0x12   : > { %v289_v29 = vrot.slane %v210_v28, %v288_v22  ;;  %v293_v30 = vrot.slane %v210_v28, %v292_v23  ;;  %v239_v33 = vrot.slane %v210_v28, %v238_v24  ;;  %v243_v34 = vrot.slane %v210_v28, %v242_v25 }
  0x13   : > { %v339_v35 = vrot.slane %v210_v28, %v338_v26  ;;  %v343_v36 = vrot.slane %v210_v28, %v342_v27  ;;  %v389_v47 = vrot.slane %v210_v28, %v388_v37  ;;  %v393_v48 = vrot.slane %v210_v28, %v392_v38 }
  0x14   : > { %v299_v39 = vrot.slane %v289_v29, %v288_v22  ;;  %v303_v40 = vrot.slane %v293_v30, %v288_v22  ;;  %v249_v43 = vrot.slane %v239_v33, %v238_v24  ;;  %v253_v44 = vrot.slane %v243_v34, %v238_v24 }
  0x15   : > { %279 = vperm.xlu1 %591, %v213_v0   ;;  %283 = vperm.xlu0 %590, %v214_v3   ;;  %v349_v45 = vrot.slane %v339_v35, %v338_v26  ;;  %v353_v46 = vrot.slane %v343_v36, %v338_v26  ;;  %v399_v63 = vrot.slane %v389_v47, %v388_v37 }
  0x19   : > { %592 = vset.pattern.permute.xlu1 %v624_v6  ;;  %593 = vset.pattern.permute.xlu0 %v624_v6 }
  0x1a   : > { %321 = vperm.xlu1 %592, %v211_v1   ;;  %325 = vperm.xlu0 %593, %v212_v4  }
  0x1e   : > { %329 = vperm.xlu1 %592, %v213_v0   ;;  %594 = vset.pattern.permute.xlu0 %v625_v7 }
  0x1f   : > { %371 = vperm.xlu0 %594, %v211_v1  }
  0x22   : > { %333 = vperm.xlu1 %592, %v214_v3  }
  0x23   : > { %383 = vperm.xlu0 %594, %v214_v3  }
  0x26   : > { %595 = vset.pattern.permute.xlu1 %v625_v7 }
  0x27   : > { %375 = vperm.xlu1 %595, %v212_v4   ;;  %597 = vset.pattern.permute.xlu0 %v622_v2 }
  0x28   : > { %431 = vperm.xlu0 %597, %v421_v8  }
  0x2b   : > { %379 = vperm.xlu1 %595, %v213_v0   ;;  %v403_v0 = vrot.slane %v393_v48, %v388_v37 }
  0x2f   : > { %596 = vset.pattern.permute.xlu1 %v622_v2 }
  0x30   : > { %426 = vperm.xlu1 %596, %v420_v9  }
  0x34   : > { %436 = vperm.xlu1 %596, %v422_v10  }
  0x38   : > { %441 = vperm.xlu1 %596, %v423_v11  }
  0x87   : > { %v690_v12 = vpop.permute.xlu1 %227  ;;  %v218_v13 = vpop.permute.xlu0 %217 }
  0x88   : > { %v254_v54 = vmul.f32 %v249_v43, %v218_v13  ;;  %v255_v55 = vmul.f32 %v253_v44, %v218_v13  ;;  %v258_v19 = vmul.f32 %v249_v43, %v690_v12  ;;  %v259_v22 = vmul.f32 %v253_v44, %v690_v12 }
  0x8b   : > { %v693_v14 = vpop.permute.xlu1 %232  ;;  %v223_v15 = vpop.permute.xlu0 %222 }
  0x8c   : > { %v256_v49 = vmul.f32 %v249_v43, %v223_v15  ;;  %v257_v50 = vmul.f32 %v253_v44, %v223_v15  ;;  %v260_v29 = vmul.f32 %v249_v43, %v693_v14  ;;  %v261_v12 = vmul.f32 %v253_v44, %v693_v14 }
  0x90   : > { %v276_v17 = vpop.permute.xlu1 %275  ;;  %v272_v18 = vpop.permute.xlu0 %271 }
  0x91   : > { %v306_v51 = vmul.f32 %v299_v39, %v276_v17  ;;  %v307_v52 = vmul.f32 %v303_v40, %v276_v17  ;;  %v304_v56 = vmul.f32 %v299_v39, %v272_v18  ;;  %v305_v57 = vmul.f32 %v303_v40, %v272_v18 }
  0x93   : > { %v314_v61 = vadd.f32 %v306_v51, %v256_v49  ;;  %v315_v62 = vadd.f32 %v307_v52, %v257_v50  ;;  %v312_v1 = vadd.f32 %v304_v56, %v254_v54  ;;  %v313_v2 = vadd.f32 %v305_v57, %v255_v55 }
  0x94   : > { %v280_v20 = vpop.permute.xlu1 %279  ;;  %v699_v21 = vpop.permute.xlu0 %283 }
  0x95   : > { %v308_v10 = vmul.f32 %v299_v39, %v280_v20  ;;  %v309_v11 = vmul.f32 %v303_v40, %v280_v20  ;;  %v310_v23 = vmul.f32 %v299_v39, %v699_v21  ;;  %v311_v24 = vmul.f32 %v303_v40, %v699_v21 }
  0x97   : > { %v317_v21 = vadd.f32 %v309_v11, %v259_v22  ;;  %v318_v39 = vadd.f32 %v310_v23, %v260_v29  ;;  %v319_v40 = vadd.f32 %v311_v24, %v261_v12 }
  0x99   : > { %v322_v31 = vpop.permute.xlu1 %321  ;;  %v326_v32 = vpop.permute.xlu0 %325 }
  0x9a   : > { %v356_v58 = vmul.f32 %v349_v45, %v326_v32  ;;  %v357_v59 = vmul.f32 %v353_v46, %v326_v32  ;;  %v354_v3 = vmul.f32 %v349_v45, %v322_v31  ;;  %v355_v4 = vmul.f32 %v353_v46, %v322_v31 }
  0x9b   : > { %v316_v32 = vadd.f32 %v308_v10, %v258_v19 }
  0x9c   : > { %v364_v6 = vadd.f32 %v356_v58, %v314_v61  ;;  %v365_v7 = vadd.f32 %v357_v59, %v315_v62  ;;  %v362_v20 = vadd.f32 %v354_v3, %v312_v1  ;;  %v363_v26 = vadd.f32 %v355_v4, %v313_v2 }
  0x9d   : > { %v330_v41 = vpop.permute.xlu1 %329 }
  0x9e   : > { %v372_v42 = vpop.permute.xlu0 %371  ;;  %v358_v30 = vmul.f32 %v349_v45, %v330_v41  ;;  %v359_v31 = vmul.f32 %v353_v46, %v330_v41 }
  0x9f   : > { %v404_v15 = vmul.f32 %v399_v63, %v372_v42  ;;  %v405_v16 = vmul.f32 %v403_v0, %v372_v42 }
  0xa0   : > { %v366_v43 = vadd.f32 %v358_v30, %v316_v32  ;;  %v367_v14 = vadd.f32 %v359_v31, %v317_v21 }
  0xa1   : > { %v334_v53 = vpop.permute.xlu1 %333  ;;  %v412_v33 = vadd.f32 %v404_v15, %v362_v20  ;;  %v413_v34 = vadd.f32 %v405_v16, %v363_v26 }
  0xa2   : > { %v384_v60 = vpop.permute.xlu0 %383  ;;  %v360_v35 = vmul.f32 %v349_v45, %v334_v53  ;;  %v361_v36 = vmul.f32 %v353_v46, %v334_v53 }
  0xa3   : > { %v410_v47 = vmul.f32 %v399_v63, %v384_v60  ;;  %v411_v48 = vmul.f32 %v403_v0, %v384_v60 }
  0xa4   : > { %v368_v49 = vadd.f32 %v360_v35, %v318_v39  ;;  %v369_v50 = vadd.f32 %v361_v36, %v319_v40 }
  0xa6   : > { %v376_v5 = vpop.permute.xlu1 %375  ;;  %v418_v54 = vadd.f32 %v410_v47, %v368_v49  ;;  %v419_v55 = vadd.f32 %v411_v48, %v369_v50 }
  0xa7   : > { %v406_v8 = vmul.f32 %v399_v63, %v376_v5  ;;  %v407_v9 = vmul.f32 %v403_v0, %v376_v5  ;;  %v432_v13 = vpop.permute.xlu0 %431 }
  0xa9   : > { %v414_v17 = vadd.f32 %v406_v8, %v364_v6  ;;  %v415_v18 = vadd.f32 %v407_v9, %v365_v7 }
  0xaa   : > { %v380_v25 = vpop.permute.xlu1 %379 }
  0xab   : > { %v446_v27 = vadd.f32 %v432_v13, %v414_v17  ;;  %v447_v28 = vadd.f32 %v432_v13, %v415_v18  ;;  %v408_v37 = vmul.f32 %v399_v63, %v380_v25  ;;  %v409_v38 = vmul.f32 %v403_v0, %v380_v25 }
  0xad   : > { %454 = vst [vmem:[%s712_s12 + $0x10] sm:$0xff] %v446_v27  ;;  %455 = vst [vmem:[%s712_s12 + $0x18] sm:$0xff] %v447_v28  ;;  %v416_v45 = vadd.f32 %v408_v37, %v366_v43  ;;  %v417_v46 = vadd.f32 %v409_v38, %v367_v14 }
  0xaf   : > { %v427_v42 = vpop.permute.xlu1 %426 }
  0xb0   : > { %v444_v41 = vadd.f32 %v427_v42, %v412_v33  ;;  %v445_v44 = vadd.f32 %v427_v42, %v413_v34 }
  0xb2   : > { %452 = vst [vmem:[%s712_s12] sm:$0xff] %v444_v41  ;;  %453 = vst [vmem:[%s712_s12 + $0x8] sm:$0xff] %v445_v44 }
  0xb3   : > { %v437_v51 = vpop.permute.xlu1 %436 }
  0xb4   : > { %v448_v52 = vadd.f32 %v437_v51, %v416_v45  ;;  %v449_v53 = vadd.f32 %v437_v51, %v417_v46 }
  0xb6   : > { %456 = vst [vmem:[%s712_s12 + $0x20] sm:$0xff] %v448_v52  ;;  %457 = vst [vmem:[%s712_s12 + $0x28] sm:$0xff] %v449_v53 }
  0xb7   : > { %v442_v56 = vpop.permute.xlu1 %441 }
  0xb8   : > { %v450_v57 = vadd.f32 %v442_v56, %v418_v54  ;;  %v451_v58 = vadd.f32 %v442_v56, %v419_v55 }
  0xba   : > { %458 = vst [vmem:[%s712_s12 + $0x30] sm:$0xff] %v450_v57  ;;  %459 = vst [vmem:[%s712_s12 + $0x38] sm:$0xff] %v451_v58 }
  0xbb PF: > { %s13_s14 = sadd.s32 1, %s620_s14   ;;  %s737_s12 = smov %s616_s13 }
  0xbc   : > { %p10_p5 = scmp.ge.s32.totalorder %s13_s14, 4   ;;  %s738_s13 = smov %s740_s15 }
  0xbe   :  { %12 = sbr.rel (!%p10_p5) target bundleno = 2 (0x2), region = 62 }

</bundles_post_ra>
